<compile_context>
chip_gen: v6e
topology: v6e:2x2x1
jax: 0.10.0
libtpu: 0.0.40
codegen_flags: <defaults>
</compile_context>

<pallas_src>
import functools

import jax
import jax.numpy as jnp
from jax.experimental import pallas as pl
from jax.experimental.pallas import tpu as pltpu

LOG_STD_MIN = -20.0
LOG_STD_MAX = 2.0


def _round_up(x, m):
    return ((x + m - 1) // m) * m


def _fcgp_kernel(s_ref, p_ref, out_ref, *,
                 input_dim, width, a_dim,
                 off_w2, off_wh, off_b1, off_b2, off_bh):
    """Fused 3-matmul MLP head.

    s_ref   : (TB, input_dim)   state tile
    p_ref   : (rows, width)     packed, lane-padded parameter blob
    out_ref : (TB, width)       [mean | log_std | zero padding]
    """
    s = s_ref[...]

    w1 = p_ref[0:input_dim, :]                 # (input_dim, W)
    w2 = p_ref[off_w2:off_w2 + width, :]       # (W, W)  zero rows >= h1
    wh = p_ref[off_wh:off_wh + width, :]       # (W, W)  zero rows >= h2, = [Wm|Ws|0]
    b1 = p_ref[off_b1:off_b1 + 1, :]           # (1, W)
    b2 = p_ref[off_b2:off_b2 + 1, :]           # (1, W)
    bh = p_ref[off_bh:off_bh + 1, :]           # (1, W)  = [bm|bs|0]

    h = jnp.maximum(jnp.dot(s, w1, preferred_element_type=jnp.float32) + b1, 0.0)
    h = jnp.maximum(jnp.dot(h, w2, preferred_element_type=jnp.float32) + b2, 0.0)

    head = jnp.dot(h, wh, preferred_element_type=jnp.float32) + bh  # (TB, W)

    # clamp only the log_std half (columns >= A).  Columns >= 2A are exact
    # zeros (padded weights/bias) and are sliced away by the wrapper.
    col = jax.lax.broadcasted_iota(jnp.int32, head.shape, 1)
    clamped = jnp.clip(head, LOG_STD_MIN, LOG_STD_MAX)
    out_ref[...] = jnp.where(col >= a_dim, clamped, head)


def pack_params(w1, b1, w2, b2, wm, bm, ws, bs):
    """Pack all Linear params into one f32 blob with lane-padded columns and
    8-aligned row offsets.  Returns (blob, static_layout_dict)."""
    input_dim, h1 = w1.shape
    h2 = w2.shape[1]
    a_dim = wm.shape[1]
    two_a = 2 * a_dim

    width = _round_up(max(h1, h2, two_a), 128)   # common lane-aligned width

    def pad_to(x, rows, cols):
        return jnp.pad(x, ((0, rows - x.shape[0]), (0, cols - x.shape[1])))

    wh = jnp.concatenate([wm, ws], axis=1)       # (h2, 2A)
    bh = jnp.concatenate([bm, bs], axis=1)       # (1, 2A)

    off_w2 = _round_up(input_dim, 8)
    off_wh = off_w2 + width
    off_b1 = off_wh + width
    off_b2 = off_b1 + 1
    off_bh = off_b2 + 1
    rows = off_bh + 1

    blob = jnp.zeros((rows, width), jnp.float32)
    blob = blob.at[0:input_dim, :].set(pad_to(w1.astype(jnp.float32), input_dim, width))
    blob = blob.at[off_w2:off_w2 + width, :].set(pad_to(w2.astype(jnp.float32), width, width))
    blob = blob.at[off_wh:off_wh + width, :].set(pad_to(wh.astype(jnp.float32), width, width))
    blob = blob.at[off_b1:off_b1 + 1, :].set(pad_to(b1.astype(jnp.float32), 1, width))
    blob = blob.at[off_b2:off_b2 + 1, :].set(pad_to(b2.astype(jnp.float32), 1, width))
    blob = blob.at[off_bh:off_bh + 1, :].set(pad_to(bh.astype(jnp.float32), 1, width))

    layout = dict(input_dim=input_dim, width=width, a_dim=a_dim,
                  off_w2=off_w2, off_wh=off_wh,
                  off_b1=off_b1, off_b2=off_b2, off_bh=off_bh)
    return blob, layout


@jax.jit
def fcgp_forward(state, w1, b1, w2, b2, wm, bm, ws, bs):
    squeeze = state.ndim == 1
    if squeeze:
        state = state[None, :]
    state = state.astype(jnp.float32)

    B, input_dim = state.shape
    a_dim = wm.shape[1]

    blob, layout = pack_params(w1, b1, w2, b2, wm, bm, ws, bs)
    p_rows, width = blob.shape

    # Batch tile: multiple of 8 sublanes, capped at 512 rows (fits comfortably
    # in VMEM on every generation, incl. v7x's 64 MiB, with double buffering).
    tb = min(512, _round_up(B, 8))
    grid = (pl.cdiv(B, tb),)

    kernel = functools.partial(_fcgp_kernel, **layout)

    flops = 2 * B * width * (input_dim + 2 * width)
    bytes_accessed = 4 * (B * input_dim + p_rows * width + B * width)

    out = pl.pallas_call(
        kernel,
        out_shape=jax.ShapeDtypeStruct((B, width), jnp.float32),
        grid=grid,
        in_specs=[
            pl.BlockSpec((tb, input_dim), lambda i: (i, 0)),   # state tile
            pl.BlockSpec((p_rows, width), lambda i: (0, 0)),   # params, resident
        ],
        out_specs=pl.BlockSpec((tb, width), lambda i: (i, 0)),
        compiler_params=pltpu.CompilerParams(
            dimension_semantics=("parallel",)),
        cost_estimate=pl.CostEstimate(
            flops=flops, transcendentals=0, bytes_accessed=bytes_accessed),
    )(state, blob)

    mean = out[:, :a_dim]
    log_std = out[:, a_dim:2 * a_dim]
    if squeeze:
        mean = mean[0]
        log_std = log_std[0]
    return mean, log_std


def init_params(key, input_dim, hidden_dims, action_dim):
    """Deterministic init mirroring nn.Linear's U(-1/sqrt(fan_in), 1/sqrt(fan_in))."""
    def linear(key, fan_in, fan_out):
        kw, kb = jax.random.split(key)
        bound = 1.0 / jnp.sqrt(float(fan_in))
        w = jax.random.uniform(kw, (fan_in, fan_out), jnp.float32, -bound, bound)
        b = jax.random.uniform(kb, (1, fan_out), jnp.float32, -bound, bound)
        return w, b

    k1, k2, k3, k4 = jax.random.split(key, 4)
    w1, b1 = linear(k1, input_dim, hidden_dims[0])
    w2, b2 = linear(k2, hidden_dims[0], hidden_dims[1])
    wm, bm = linear(k3, hidden_dims[1], action_dim)
    ws, bs = linear(k4, hidden_dims[1], action_dim)
    return w1, b1, w2, b2, wm, bm, ws, bs


def fcgp_forward_ref(state, w1, b1, w2, b2, wm, bm, ws, bs):
    h = jax.nn.relu(state @ w1 + b1)
    h = jax.nn.relu(h @ w2 + b2)
    mean = h @ wm + bm
    log_std = jnp.clip(h @ ws + bs, LOG_STD_MIN, LOG_STD_MAX)
    return mean, log_std


if __name__ == "__main__":
    key = jax.random.PRNGKey(0)
    k_params, k_state = jax.random.split(key)

    # Small SAC-like problem: 8-dim observation, 2-dim action, hidden (32, 32).
    batch, input_dim, action_dim = 8, 8, 2
    hidden_dims = (32, 32)

    params = init_params(k_params, input_dim, hidden_dims, action_dim)
    state = jax.random.normal(k_state, (batch, input_dim), jnp.float32)

    mean, log_std = fcgp_forward(state, *params)
    jax.block_until_ready((mean, log_std))

    mean_ref, log_std_ref = fcgp_forward_ref(state, *params)
    assert mean.shape == (batch, action_dim)
    assert log_std.shape == (batch, action_dim)
    assert jnp.allclose(mean, mean_ref, atol=1e-5, rtol=1e-5)
    assert jnp.allclose(log_std, log_std_ref, atol=1e-5, rtol=1e-5)

    # TODO(synk): full_pass()'s tanh-Normal sampling / rescale / log_prob and the
    # alpha optimizer are training-time host logic, not part of forward().

    print("KERNEL_OK")
</pallas_src>

<mosaic_0001>
module attributes {stable_mosaic.version = 11 : i64} {
  func.func @_fcgp_kernel(%arg0: i32, %arg1: memref<8x8xf32, #tpu.memory_space<vmem>>, %arg2: memref<267x128xf32, #tpu.memory_space<vmem>>, %arg3: memref<8x128xf32, #tpu.memory_space<vmem>>) attributes {dimension_semantics = [#tpu.dimension_semantics<parallel>], iteration_bounds = array<i64: 1>, scalar_prefetch = 0 : i64, scratch_operands = 0 : i64, tpu.core_type = #tpu.core_type<tc>, window_params = [{transform_indices = @transform_0, window_bounds = array<i64: 8, 8>}, {pipeline_mode = #tpu.pipeline_mode<synchronous>, transform_indices = @transform_1, window_bounds = array<i64: 267, 128>}, {transform_indices = @transform_2, window_bounds = array<i64: 8, 128>}]} {
    %c0 = arith.constant 0 : index
    %c0_0 = arith.constant 0 : index
    %0 = vector.load %arg1[%c0, %c0_0] : memref<8x8xf32, #tpu.memory_space<vmem>>, vector<8x8xf32>
    %c0_1 = arith.constant 0 : index
    %c0_2 = arith.constant 0 : index
    %1 = vector.load %arg2[%c0_1, %c0_2] : memref<267x128xf32, #tpu.memory_space<vmem>>, vector<8x128xf32>
    %c8 = arith.constant 8 : index
    %c0_3 = arith.constant 0 : index
    %2 = vector.load %arg2[%c8, %c0_3] : memref<267x128xf32, #tpu.memory_space<vmem>>, vector<128x128xf32>
    %c136 = arith.constant 136 : index
    %c0_4 = arith.constant 0 : index
    %3 = vector.load %arg2[%c136, %c0_4] : memref<267x128xf32, #tpu.memory_space<vmem>>, vector<128x128xf32>
    %c264 = arith.constant 264 : index
    %c0_5 = arith.constant 0 : index
    %4 = vector.load %arg2[%c264, %c0_5] : memref<267x128xf32, #tpu.memory_space<vmem>>, vector<1x128xf32>
    %c265 = arith.constant 265 : index
    %c0_6 = arith.constant 0 : index
    %5 = vector.load %arg2[%c265, %c0_6] : memref<267x128xf32, #tpu.memory_space<vmem>>, vector<1x128xf32>
    %c266 = arith.constant 266 : index
    %c0_7 = arith.constant 0 : index
    %6 = vector.load %arg2[%c266, %c0_7] : memref<267x128xf32, #tpu.memory_space<vmem>>, vector<1x128xf32>
    %cst = arith.constant dense<0.000000e+00> : vector<8x128xf32>
    %7 = tpu.matmul %0, %1, %cst {dimension_numbers = #tpu.dot_dimension_numbers<[1], [0], [0], [1], [0, 0, 1, 1], [], []>} : vector<8x8xf32>, vector<8x128xf32>, vector<8x128xf32> -> vector<8x128xf32>
    %8 = vector.broadcast %4 : vector<1x128xf32> to vector<8x128xf32>
    %9 = arith.addf %7, %8 : vector<8x128xf32>
    %cst_8 = arith.constant 0.000000e+00 : f32
    %10 = vector.broadcast %cst_8 : f32 to vector<8x128xf32>
    %11 = arith.maximumf %9, %10 : vector<8x128xf32>
    %cst_9 = arith.constant dense<0.000000e+00> : vector<8x128xf32>
    %12 = tpu.matmul %11, %2, %cst_9 {dimension_numbers = #tpu.dot_dimension_numbers<[1], [0], [0], [1], [0, 0, 1, 1], [], []>} : vector<8x128xf32>, vector<128x128xf32>, vector<8x128xf32> -> vector<8x128xf32>
    %13 = vector.broadcast %5 : vector<1x128xf32> to vector<8x128xf32>
    %14 = arith.addf %12, %13 : vector<8x128xf32>
    %cst_10 = arith.constant 0.000000e+00 : f32
    %15 = vector.broadcast %cst_10 : f32 to vector<8x128xf32>
    %16 = arith.maximumf %14, %15 : vector<8x128xf32>
    %cst_11 = arith.constant dense<0.000000e+00> : vector<8x128xf32>
    %17 = tpu.matmul %16, %3, %cst_11 {dimension_numbers = #tpu.dot_dimension_numbers<[1], [0], [0], [1], [0, 0, 1, 1], [], []>} : vector<8x128xf32>, vector<128x128xf32>, vector<8x128xf32> -> vector<8x128xf32>
    %18 = vector.broadcast %6 : vector<1x128xf32> to vector<8x128xf32>
    %19 = arith.addf %17, %18 : vector<8x128xf32>
    %20 = tpu.iota {dimensions = array<i32: 1>} : vector<8x128xi32>
    %cst_12 = arith.constant -2.000000e+01 : f32
    %cst_13 = arith.constant 2.000000e+00 : f32
    %21 = vector.broadcast %cst_12 : f32 to vector<8x128xf32>
    %22 = arith.maximumf %21, %19 : vector<8x128xf32>
    %23 = vector.broadcast %cst_13 : f32 to vector<8x128xf32>
    %24 = arith.minimumf %23, %22 : vector<8x128xf32>
    %c2_i32 = arith.constant 2 : i32
    %25 = vector.broadcast %c2_i32 : i32 to vector<8x128xi32>
    %26 = arith.cmpi sge, %20, %25 : vector<8x128xi32>
    %27 = arith.select %26, %24, %19 : vector<8x128xi1>, vector<8x128xf32>
    %c0_14 = arith.constant 0 : index
    %c0_15 = arith.constant 0 : index
    %28 = vector.load %arg3[%c0_14, %c0_15] : memref<8x128xf32, #tpu.memory_space<vmem>>, vector<8x128xf32>
    tpu.vector_store %arg3[%c0_14, %c0_15], %27 {strides = array<i32>} : memref<8x128xf32, #tpu.memory_space<vmem>>, vector<8x128xf32>,
    return
  }
  func.func @transform_0(%arg0: i32) -> (i32, i32) {
    %c0_i32 = arith.constant 0 : i32
    %c0_i32_0 = arith.constant 0 : i32
    return %arg0, %c0_i32 : i32, i32
  }
  func.func @transform_1(%arg0: i32) -> (i32, i32) {
    %c0_i32 = arith.constant 0 : i32
    %c0_i32_0 = arith.constant 0 : i32
    %c0_i32_1 = arith.constant 0 : i32
    return %c0_i32, %c0_i32_0 : i32, i32
  }
  func.func @transform_2(%arg0: i32) -> (i32, i32) {
    %c0_i32 = arith.constant 0 : i32
    %c0_i32_0 = arith.constant 0 : i32
    return %arg0, %c0_i32 : i32, i32
  }
}

</mosaic_0001>

<bundles_post_ra>
// kernel: fcgp_forward.1
= control target key start
LH: loop header
LB: loop body
LE: loop exit
PB: predicated region body
PF: predicated region fallthrough
CT: control target
= control target key end

     0   :  { %vm52_vm0 = vcmask 64512   ;;  %v404_v0 = vmov 0.0   ;;  %vm405_vm1 = vmmov 0   ;;  %v276_v45 = vlaneseq  ;;  %s574_s1 = inlined_call_operand.vmem [shape: f32[267,128], index: 1, kind: input, shape index: {}]   ;;  %s575_s0 = inlined_call_operand.vmem [shape: f32[8,8], index: 0, kind: input, shape index: {}]   ;;  %s576_s2 = inlined_call_operand.vmem [shape: f32[8,128], index: 2, kind: output, shape index: {}]  }
   0x1   :  { %327 = vmatprep.subr.mxu0 %v404_v0  ;;  %v12_v1 = vld [vmem:[%s574_s1] sm:$0xff]  ;;  %329 = vmatprep.mubr.msk.f32.mxu0 %vm405_vm1, %v404_v0  ;;  %v27_v4 = vld [vmem:[%s574_s1 + $0x78] sm:$0xff]  ;;  %v26_v5 = vld [vmem:[%s574_s1 + $0x70] sm:$0xff] }
   0x2   :  { %v11_v2 = vld [vmem:[%s575_s0] sm:$0xff]  ;;  %328 = vmatpush3.msra.mxu0 %v12_v1  ;;  %332 = vmatprep.subr.mxu1 %v404_v0  ;;  %v25_v6 = vld [vmem:[%s574_s1 + $0x68] sm:$0xff]  ;;  %v23_v8 = vld [vmem:[%s574_s1 + $0x58] sm:$0xff]  ;;  %v277_v48 = vand.u32 127, %v276_v45 }
   0x3   :  { %v28_v3 = vld [vmem:[%s574_s1 + $0x80] sm:$0xff]  ;;  %330 = vmatmul.mubr.msk.f32.vlgmr.msra.gmra.mxu0 %vm52_vm0, %v11_v2  ;;  %364 = vmatprep.mubr.msk.f32.mxu1 %vm405_vm1, %v404_v0  ;;  %v22_v9 = vld [vmem:[%s574_s1 + $0x50] sm:$0xff]  ;;  %v21_v10 = vld [vmem:[%s574_s1 + $0x48] sm:$0xff] }
   0x4   :  { %333 = vmatpush3.msra.mxu1 %v28_v3  ;;  %367 = vmatprep.subr.mxu0 %v404_v0  ;;  %v24_v7 = vld [vmem:[%s574_s1 + $0x60] sm:$0xff]  ;;  %v19_v12 = vld [vmem:[%s574_s1 + $0x38] sm:$0xff]  ;;  %v18_v13 = vld [vmem:[%s574_s1 + $0x30] sm:$0xff]  ;;  %vm280_vm2 = vcmp.ge.s32.totalorder %v277_v48, 2 }
   0x5   :  { %334 = vmatprep.subr.mxu1 %v404_v0  ;;  %399 = vmatprep.mubr.msk.f32.mxu0 %vm405_vm1, %v404_v0  ;;  %v20_v11 = vld [vmem:[%s574_s1 + $0x40] sm:$0xff]  ;;  %v17_v14 = vld [vmem:[%s574_s1 + $0x28] sm:$0xff]  ;;  %v15_v16 = vld [vmem:[%s574_s1 + $0x18] sm:$0xff] }
   0x6   :  { %335 = vmatpush3.msra.mxu1 %v27_v4  ;;  %v16_v15 = vld [vmem:[%s574_s1 + $0x20] sm:$0xff]  ;;  %v14_v17 = vld [vmem:[%s574_s1 + $0x10] sm:$0xff]  ;;  %v13_v18 = vld [vmem:[%s574_s1 + $0x8] sm:$0xff] }
   0x7   :  { %336 = vmatprep.subr.mxu1 %v404_v0  ;;  %v44_v19 = vld [vmem:[%s574_s1 + $0x100] sm:$0xff]  ;;  %v43_v20 = vld [vmem:[%s574_s1 + $0xf8] sm:$0xff]  ;;  %v42_v21 = vld [vmem:[%s574_s1 + $0xf0] sm:$0xff] }
   0x8   :  { %337 = vmatpush3.msra.mxu1 %v26_v5  ;;  %368 = vmatpush3.msra.mxu0 %v44_v19  ;;  %v41_v22 = vld [vmem:[%s574_s1 + $0xe8] sm:$0xff]  ;;  %v40_v23 = vld [vmem:[%s574_s1 + $0xe0] sm:$0xff]  ;;  %v39_v24 = vld [vmem:[%s574_s1 + $0xd8] sm:$0xff] }
   0x9   :  { %338 = vmatprep.subr.mxu1 %v404_v0  ;;  %369 = vmatprep.subr.mxu0 %v404_v0  ;;  %v38_v25 = vld [vmem:[%s574_s1 + $0xd0] sm:$0xff]  ;;  %v37_v26 = vld [vmem:[%s574_s1 + $0xc8] sm:$0xff]  ;;  %v36_v27 = vld [vmem:[%s574_s1 + $0xc0] sm:$0xff] }
   0xa   :  { %339 = vmatpush3.msra.mxu1 %v25_v6  ;;  %370 = vmatpush3.msra.mxu0 %v43_v20  ;;  %v35_v28 = vld [vmem:[%s574_s1 + $0xb8] sm:$0xff]  ;;  %v34_v29 = vld [vmem:[%s574_s1 + $0xb0] sm:$0xff]  ;;  %v33_v30 = vld [vmem:[%s574_s1 + $0xa8] sm:$0xff] }
   0xb   :  { %340 = vmatprep.subr.mxu1 %v404_v0  ;;  %371 = vmatprep.subr.mxu0 %v404_v0  ;;  %v32_v31 = vld [vmem:[%s574_s1 + $0xa0] sm:$0xff]  ;;  %v287_v32 = vld [vmem:[%s574_s1 + $0x108] ss:$0 sm:$0xff]  ;;  %v31_v37 = vld [vmem:[%s574_s1 + $0x98] sm:$0xff] }
   0xc   :  { %341 = vmatpush3.msra.mxu1 %v24_v7  ;;  %372 = vmatpush3.msra.mxu0 %v42_v21  ;;  %v30_v38 = vld [vmem:[%s574_s1 + $0x90] sm:$0xff]  ;;  %v29_v39 = vld [vmem:[%s574_s1 + $0x88] sm:$0xff] }
   0xd   :  { %342 = vmatprep.subr.mxu1 %v404_v0  ;;  %373 = vmatprep.subr.mxu0 %v404_v0  ;;  %v289_v40 = vld [vmem:[%s574_s1 + $0x109] ss:$0 sm:$0xff]  ;;  %v290_v46 = vld [vmem:[%s574_s1 + $0x10a] ss:$0 sm:$0xff] }
   0xe   :  { %343 = vmatpush3.msra.mxu1 %v23_v8  ;;  %374 = vmatpush3.msra.mxu0 %v41_v22 }
   0xf   :  { %344 = vmatprep.subr.mxu1 %v404_v0  ;;  %375 = vmatprep.subr.mxu0 %v404_v0 }
  0x10   :  { %345 = vmatpush3.msra.mxu1 %v22_v9  ;;  %376 = vmatpush3.msra.mxu0 %v40_v23 }
  0x11   :  { %346 = vmatprep.subr.mxu1 %v404_v0  ;;  %377 = vmatprep.subr.mxu0 %v404_v0 }
  0x12   :  { %347 = vmatpush3.msra.mxu1 %v21_v10  ;;  %378 = vmatpush3.msra.mxu0 %v39_v24 }
  0x13   :  { %348 = vmatprep.subr.mxu1 %v404_v0  ;;  %379 = vmatprep.subr.mxu0 %v404_v0 }
  0x14   :  { %349 = vmatpush3.msra.mxu1 %v20_v11  ;;  %380 = vmatpush3.msra.mxu0 %v38_v25 }
  0x15   :  { %350 = vmatprep.subr.mxu1 %v404_v0  ;;  %381 = vmatprep.subr.mxu0 %v404_v0 }
  0x16   :  { %351 = vmatpush3.msra.mxu1 %v19_v12  ;;  %382 = vmatpush3.msra.mxu0 %v37_v26 }
  0x17   :  { %352 = vmatprep.subr.mxu1 %v404_v0  ;;  %383 = vmatprep.subr.mxu0 %v404_v0 }
  0x18   :  { %353 = vmatpush3.msra.mxu1 %v18_v13  ;;  %384 = vmatpush3.msra.mxu0 %v36_v27 }
  0x19   :  { %354 = vmatprep.subr.mxu1 %v404_v0  ;;  %385 = vmatprep.subr.mxu0 %v404_v0 }
  0x1a   :  { %355 = vmatpush3.msra.mxu1 %v17_v14  ;;  %386 = vmatpush3.msra.mxu0 %v35_v28 }
  0x1b   :  { %356 = vmatprep.subr.mxu1 %v404_v0  ;;  %387 = vmatprep.subr.mxu0 %v404_v0 }
  0x1c   :  { %357 = vmatpush3.msra.mxu1 %v16_v15  ;;  %388 = vmatpush3.msra.mxu0 %v34_v29 }
  0x1d   :  { %358 = vmatprep.subr.mxu1 %v404_v0  ;;  %389 = vmatprep.subr.mxu0 %v404_v0 }
  0x1e   :  { %359 = vmatpush3.msra.mxu1 %v15_v16  ;;  %390 = vmatpush3.msra.mxu0 %v33_v30 }
  0x1f   :  { %360 = vmatprep.subr.mxu1 %v404_v0  ;;  %391 = vmatprep.subr.mxu0 %v404_v0 }
  0x20   :  { %361 = vmatpush3.msra.mxu1 %v14_v17  ;;  %392 = vmatpush3.msra.mxu0 %v32_v31 }
  0x21   :  { %362 = vmatprep.subr.mxu1 %v404_v0  ;;  %393 = vmatprep.subr.mxu0 %v404_v0 }
  0x22   :  { %363 = vmatpush3.msra.mxu1 %v13_v18  ;;  %394 = vmatpush3.msra.mxu0 %v31_v37 }
  0x23   :  { %395 = vmatprep.subr.mxu0 %v404_v0 }
  0x24   :  { %396 = vmatpush3.msra.mxu0 %v30_v38 }
  0x25   :  { %397 = vmatprep.subr.mxu0 %v404_v0 }
  0x26   :  { %398 = vmatpush3.msra.mxu0 %v29_v39 }
  0xc3   :  { %v122_v33 = vpop.f32.mrf.mxu0 }
  0xc4   :  { %v123_v34 = vadd.f32 %v287_v32, %v122_v33 }
  0xc5   :  { %v331_v35 = vpop.f32.mrf.mxu0 }
  0xc6   :  { %v126_v36 = vmax.f32 %v123_v34, 0.0 }
  0xc8   :  { %365 = vmatmul.mubr.f32.vlgmr.msra.gmra.mxu1 %v126_v36 }
 0x188   :  { %v197_v41 = vpop.f32.mrf.mxu1 }
 0x189   :  { %v198_v42 = vadd.f32 %v289_v40, %v197_v41 }
 0x18a   :  { %v366_v43 = vpop.f32.mrf.mxu1 }
 0x18b   :  { %v201_v44 = vmax.f32 %v198_v42, 0.0 }
 0x18d   :  { %400 = vmatmul.mubr.f32.vlgmr.msra.gmra.mxu0 %v201_v44 }
 0x24d   :  { %v272_v47 = vpop.f32.mrf.mxu0 }
 0x24e   :  { %v273_v49 = vadd.f32 %v290_v46, %v272_v47 }
 0x24f   :  { %v401_v50 = vpop.f32.mrf.mxu0 }
 0x250   :  { %v278_v51 = vmax.f32 %v273_v49, -20.0 }
 0x252   :  { %v279_v52 = vmin.f32 %v278_v51, 2.0 }
 0x254   :  { %v281_v53 = vsel %vm280_vm2, %v279_v52, %v273_v49 }
 0x255   :  { %282 = vst [vmem:[%s576_s2] sm:$0xff] %v281_v53 }

</bundles_post_ra>
